<compile_context>
chip_gen: v7x
topology: tpu7x:2x2x1
jax: 0.10.0
libtpu: 0.0.40
codegen_flags: <defaults>
</compile_context>

<pallas_src>
import math

import jax
import jax.numpy as jnp
from jax.experimental import pallas as pl
from jax.experimental.pallas import tpu as pltpu


def _round_up(x, m):
    return ((x + m - 1) // m) * m


def _choose_tile_b(B, tile_b):
    """Large tiles to amortize per-step overhead, but >=2 grid steps when B>8
    so v7x's two TensorCores both get work under dimension_semantics=parallel."""
    tb = min(tile_b, _round_up(B, 8))
    if B > 8:
        tb = min(tb, _round_up((B + 1) // 2, 8))
    return max(tb, 8)


def qvalue_kernel(x_ref, w1_ref, b1_ref, w2_ref, b2_ref, w3_ref, b3_ref, o_ref):
    f32 = jnp.float32

    # Layer 1: relu(x @ W1 + b1).  K = n_states + n_actions is tiny (<=8 here),
    # but a K<=256 contraction is a single MXU pass, so this is essentially free
    # compared with the old rank-1 VPU loop on the serial critical path.
    h1 = jnp.dot(x_ref[...], w1_ref[...], preferred_element_type=f32)
    h1 = jnp.maximum(h1 + b1_ref[...].astype(f32), 0.0)

    # Layer 2: relu(h1 @ W2 + b2) — the dominant GEMM.  Cast activations to the
    # weight dtype (f32 or bf16) for MXU throughput on every generation
    # (v5e/v6e/v7x MXUs are bf16-native); accumulate in f32.
    w2 = w2_ref[...]
    h2 = jnp.dot(h1.astype(w2.dtype), w2, preferred_element_type=f32)
    h2 = jnp.maximum(h2 + b2_ref[...].astype(f32), 0.0)

    # Layer 3: q = h2 @ w3^T + b3 with out_features == 1.  Keep it as a VPU
    # multiply + XLU lane reduction (the XLU has slack); b3 comes off SMEM.
    q = jnp.sum(h2 * w3_ref[...].astype(f32), axis=-1, keepdims=True)   # [tb, 1]
    q = q + b3_ref[0, 0]

    # Narrow but DMA-cheap store: the out block is [tb, 1], so HBM writeback is
    # 4 B per q value instead of the previous 512 B broadcast slab.
    o_ref[...] = q.astype(o_ref.dtype)


def qvalue_forward(states, actions, params, *, tile_b=1024,
                   compute_dtype=jnp.float32):
    """states: [B, n_states], actions: [B, n_actions] -> q: [B, 1] (float32)."""
    w1, b1, w2, b2, w3, b3 = params
    B = states.shape[0]
    d_in = w1.shape[0]
    H = w1.shape[1]

    # Fold the torch.cat into a single [B, d_in] input stream (one DMA stream,
    # one resident layer-1 weight block, and a straight MXU matmul in-kernel).
    x = jnp.concatenate([states, actions], axis=1)

    tb = _choose_tile_b(B, tile_b)
    b_pad = _round_up(B, tb)
    if b_pad != B:
        x = jnp.pad(x, ((0, b_pad - B), (0, 0)))

    if compute_dtype != jnp.float32:
        # bf16 weights halve HBM/VMEM traffic and speed up the dominant GEMM on
        # all generations (accumulation stays f32 inside the kernel).
        w2 = w2.astype(compute_dtype)

    grid = (b_pad // tb,)
    const2d = lambda i: (0, 0)

    out = pl.pallas_call(
        qvalue_kernel,
        out_shape=jax.ShapeDtypeStruct((b_pad, 1), jnp.float32),
        grid_spec=pltpu.PrefetchScalarGridSpec(
            num_scalar_prefetch=0,
            grid=grid,
            in_specs=[
                pl.BlockSpec((tb, d_in), lambda i: (i, 0)),   # x (pipelined)
                pl.BlockSpec((d_in, H), const2d),             # W1 (resident)
                pl.BlockSpec((1, H), const2d),                # b1
                pl.BlockSpec((H, H), const2d),                # W2 (resident)
                pl.BlockSpec((1, H), const2d),                # b2
                pl.BlockSpec((1, H), const2d),                # w3 (row)
                pl.BlockSpec(memory_space=pltpu.MemorySpace.SMEM),  # b3 scalar
            ],
            out_specs=pl.BlockSpec((tb, 1), lambda i: (i, 0)),
        ),
        compiler_params=pltpu.CompilerParams(
            dimension_semantics=("parallel",),          # shard batch across TCs (v7x)
            vmem_limit_bytes=32 * 1024 * 1024,          # explicit, safe on v5e/v6e/v7x
        ),
    )(x, w1, b1, w2, b2, w3, b3)

    return out[:B]


def init_params(key, n_states, n_actions, n_hidden):
    """Deterministic init mirroring the PyTorch module's initializers.

    hidden1/hidden2: kaiming (he) normal (fan_in of the concatenated input),
    bias zero.  q_value: xavier uniform, bias zero.
    """
    d_in = n_states + n_actions
    k1, k2, k3 = jax.random.split(key, 3)

    std1 = math.sqrt(2.0 / d_in)
    w1 = std1 * jax.random.normal(k1, (d_in, n_hidden), dtype=jnp.float32)
    b1 = jnp.zeros((1, n_hidden), dtype=jnp.float32)

    std2 = math.sqrt(2.0 / n_hidden)
    w2 = std2 * jax.random.normal(k2, (n_hidden, n_hidden), dtype=jnp.float32)
    b2 = jnp.zeros((1, n_hidden), dtype=jnp.float32)

    bound = math.sqrt(6.0 / (n_hidden + 1))
    w3 = jax.random.uniform(k3, (1, n_hidden), dtype=jnp.float32,
                            minval=-bound, maxval=bound)
    b3 = jnp.zeros((1, 1), dtype=jnp.float32)

    return (w1, b1, w2, b2, w3, b3)


def qvalue_reference(states, actions, params):
    """Plain-JAX reference (mirrors the PyTorch forward) for correctness checks."""
    w1, b1, w2, b2, w3, b3 = params
    hp = jax.lax.Precision.HIGHEST
    x = jnp.concatenate([states, actions], axis=1)
    h1 = jnp.maximum(jnp.dot(x, w1, precision=hp) + b1, 0.0)
    h2 = jnp.maximum(jnp.dot(h1, w2, precision=hp) + b2, 0.0)
    return jnp.dot(h2, w3.T, precision=hp) + b3


if __name__ == "__main__":
    # MountainCarContinuous-like dims (state possibly augmented with the DIAYN
    # skill one-hot); hidden = module default 256 (already lane-aligned).
    n_states, n_actions, n_hidden = 6, 2, 256

    key = jax.random.PRNGKey(0)
    kp, ks, ka, ks2, ka2 = jax.random.split(key, 5)
    params = init_params(kp, n_states, n_actions, n_hidden)

    # 1) Small RL-inference batch (single grid step).
    B = 8
    states = jax.random.normal(ks, (B, n_states), dtype=jnp.float32)
    actions = jax.random.normal(ka, (B, n_actions), dtype=jnp.float32)
    q = jax.block_until_ready(qvalue_forward(states, actions, params))
    q_ref = qvalue_reference(states, actions, params)
    assert q.shape == (B, 1)
    assert jnp.allclose(q, q_ref, atol=5e-3, rtol=5e-3), "f32 small-batch mismatch"

    # 2) Larger, non-multiple batch: exercises padding + the >=2-grid-step
    #    (2-TensorCore aware) tiling path.
    B2 = 300
    states2 = jax.random.normal(ks2, (B2, n_states), dtype=jnp.float32)
    actions2 = jax.random.normal(ka2, (B2, n_actions), dtype=jnp.float32)
    q2 = jax.block_until_ready(qvalue_forward(states2, actions2, params))
    q2_ref = qvalue_reference(states2, actions2, params)
    assert q2.shape == (B2, 1)
    assert jnp.allclose(q2, q2_ref, atol=5e-3, rtol=5e-3), "f32 tiled-batch mismatch"

    # 3) bf16 GEMM path (f32 accumulation) — loose tolerance; valid on v5e too.
    q3 = jax.block_until_ready(
        qvalue_forward(states2, actions2, params, compute_dtype=jnp.bfloat16))
    assert q3.shape == (B2, 1)
    assert jnp.allclose(q3, q2_ref, atol=1e-1, rtol=1e-1), "bf16 mismatch"

    print("KERNEL_OK")
</pallas_src>

<mosaic_0001>
module attributes {stable_mosaic.version = 11 : i64} {
  func.func @qvalue_kernel(%arg0: i32, %arg1: memref<8x8xf32, #tpu.memory_space<vmem>>, %arg2: memref<8x256xf32, #tpu.memory_space<vmem>>, %arg3: memref<1x256xf32, #tpu.memory_space<vmem>>, %arg4: memref<256x256xf32, #tpu.memory_space<vmem>>, %arg5: memref<1x256xf32, #tpu.memory_space<vmem>>, %arg6: memref<1x256xf32, #tpu.memory_space<vmem>>, %arg7: memref<1x1xf32, #tpu.memory_space<smem>>, %arg8: memref<8x1xf32, #tpu.memory_space<vmem>>) attributes {dimension_semantics = [#tpu.dimension_semantics<parallel>], iteration_bounds = array<i64: 1>, scalar_prefetch = 0 : i64, scratch_operands = 0 : i64, tpu.core_type = #tpu.core_type<tc>, window_params = [{transform_indices = @transform_0, window_bounds = array<i64: 8, 8>}, {pipeline_mode = #tpu.pipeline_mode<synchronous>, transform_indices = @transform_1, window_bounds = array<i64: 8, 256>}, {pipeline_mode = #tpu.pipeline_mode<synchronous>, transform_indices = @transform_2, window_bounds = array<i64: 1, 256>}, {pipeline_mode = #tpu.pipeline_mode<synchronous>, transform_indices = @transform_3, window_bounds = array<i64: 256, 256>}, {pipeline_mode = #tpu.pipeline_mode<synchronous>, transform_indices = @transform_4, window_bounds = array<i64: 1, 256>}, {pipeline_mode = #tpu.pipeline_mode<synchronous>, transform_indices = @transform_5, window_bounds = array<i64: 1, 256>}, {transform_indices = @transform_6, window_bounds = array<i64: 1, 1>}, {transform_indices = @transform_7, window_bounds = array<i64: 8, 1>}]} {
    %c0 = arith.constant 0 : index
    %c0_0 = arith.constant 0 : index
    %0 = vector.load %arg1[%c0, %c0_0] : memref<8x8xf32, #tpu.memory_space<vmem>>, vector<8x8xf32>
    %c0_1 = arith.constant 0 : index
    %c0_2 = arith.constant 0 : index
    %1 = vector.load %arg2[%c0_1, %c0_2] : memref<8x256xf32, #tpu.memory_space<vmem>>, vector<8x256xf32>
    %cst = arith.constant dense<0.000000e+00> : vector<8x256xf32>
    %2 = tpu.matmul %0, %1, %cst {dimension_numbers = #tpu.dot_dimension_numbers<[1], [0], [0], [1], [0, 0, 1, 1], [], []>} : vector<8x8xf32>, vector<8x256xf32>, vector<8x256xf32> -> vector<8x256xf32>
    %c0_3 = arith.constant 0 : index
    %c0_4 = arith.constant 0 : index
    %3 = vector.load %arg3[%c0_3, %c0_4] : memref<1x256xf32, #tpu.memory_space<vmem>>, vector<1x256xf32>
    %4 = vector.broadcast %3 : vector<1x256xf32> to vector<8x256xf32>
    %5 = arith.addf %2, %4 : vector<8x256xf32>
    %cst_5 = arith.constant 0.000000e+00 : f32
    %6 = vector.broadcast %cst_5 : f32 to vector<8x256xf32>
    %7 = arith.maximumf %5, %6 : vector<8x256xf32>
    %c0_6 = arith.constant 0 : index
    %c0_7 = arith.constant 0 : index
    %8 = vector.load %arg4[%c0_6, %c0_7] : memref<256x256xf32, #tpu.memory_space<vmem>>, vector<256x256xf32>
    %cst_8 = arith.constant dense<0.000000e+00> : vector<8x256xf32>
    %9 = tpu.matmul %7, %8, %cst_8 {dimension_numbers = #tpu.dot_dimension_numbers<[1], [0], [0], [1], [0, 0, 1, 1], [], []>} : vector<8x256xf32>, vector<256x256xf32>, vector<8x256xf32> -> vector<8x256xf32>
    %c0_9 = arith.constant 0 : index
    %c0_10 = arith.constant 0 : index
    %10 = vector.load %arg5[%c0_9, %c0_10] : memref<1x256xf32, #tpu.memory_space<vmem>>, vector<1x256xf32>
    %11 = vector.broadcast %10 : vector<1x256xf32> to vector<8x256xf32>
    %12 = arith.addf %9, %11 : vector<8x256xf32>
    %cst_11 = arith.constant 0.000000e+00 : f32
    %13 = vector.broadcast %cst_11 : f32 to vector<8x256xf32>
    %14 = arith.maximumf %12, %13 : vector<8x256xf32>
    %c0_12 = arith.constant 0 : index
    %c0_13 = arith.constant 0 : index
    %15 = vector.load %arg6[%c0_12, %c0_13] : memref<1x256xf32, #tpu.memory_space<vmem>>, vector<1x256xf32>
    %16 = vector.broadcast %15 : vector<1x256xf32> to vector<8x256xf32>
    %17 = arith.mulf %14, %16 : vector<8x256xf32>
    %cst_14 = arith.constant dense<0.000000e+00> : vector<8xf32>
    %18 = vector.multi_reduction <add>, %17, %cst_14 [1] : vector<8x256xf32> to vector<8xf32>
    %19 = vector.shape_cast %18 : vector<8xf32> to vector<8x1xf32>
    %c0_15 = arith.constant 0 : index
    %c0_16 = arith.constant 0 : index
    %20 = memref.load %arg7[%c0_15, %c0_16] : memref<1x1xf32, #tpu.memory_space<smem>>
    %21 = vector.broadcast %20 : f32 to vector<8x1xf32>
    %22 = arith.addf %19, %21 : vector<8x1xf32>
    %c0_17 = arith.constant 0 : index
    %c0_18 = arith.constant 0 : index
    %23 = vector.load %arg8[%c0_17, %c0_18] : memref<8x1xf32, #tpu.memory_space<vmem>>, vector<8x1xf32>
    tpu.vector_store %arg8[%c0_17, %c0_18], %22 {strides = array<i32>} : memref<8x1xf32, #tpu.memory_space<vmem>>, vector<8x1xf32>,
    return
  }
  func.func @transform_0(%arg0: i32) -> (i32, i32) {
    %c0_i32 = arith.constant 0 : i32
    %c0_i32_0 = arith.constant 0 : i32
    return %arg0, %c0_i32 : i32, i32
  }
  func.func @transform_1(%arg0: i32) -> (i32, i32) {
    %c0_i32 = arith.constant 0 : i32
    %c0_i32_0 = arith.constant 0 : i32
    %c0_i32_1 = arith.constant 0 : i32
    return %c0_i32, %c0_i32_0 : i32, i32
  }
  func.func @transform_2(%arg0: i32) -> (i32, i32) {
    %c0_i32 = arith.constant 0 : i32
    %c0_i32_0 = arith.constant 0 : i32
    %c0_i32_1 = arith.constant 0 : i32
    return %c0_i32, %c0_i32_0 : i32, i32
  }
  func.func @transform_3(%arg0: i32) -> (i32, i32) {
    %c0_i32 = arith.constant 0 : i32
    %c0_i32_0 = arith.constant 0 : i32
    %c0_i32_1 = arith.constant 0 : i32
    return %c0_i32, %c0_i32_0 : i32, i32
  }
  func.func @transform_4(%arg0: i32) -> (i32, i32) {
    %c0_i32 = arith.constant 0 : i32
    %c0_i32_0 = arith.constant 0 : i32
    %c0_i32_1 = arith.constant 0 : i32
    return %c0_i32, %c0_i32_0 : i32, i32
  }
  func.func @transform_5(%arg0: i32) -> (i32, i32) {
    %c0_i32 = arith.constant 0 : i32
    %c0_i32_0 = arith.constant 0 : i32
    %c0_i32_1 = arith.constant 0 : i32
    return %c0_i32, %c0_i32_0 : i32, i32
  }
  func.func @transform_6(%arg0: i32) -> (i32, i32) {
    %c0_i32 = arith.constant 0 : i32
    %c0_i32_0 = arith.constant 0 : i32
    %c0_i32_1 = arith.constant 0 : i32
    return %c0_i32, %c0_i32_0 : i32, i32
  }
  func.func @transform_7(%arg0: i32) -> (i32, i32) {
    %c0_i32 = arith.constant 0 : i32
    %c0_i32_0 = arith.constant 0 : i32
    return %arg0, %c0_i32 : i32, i32
  }
}

</mosaic_0001>

<bundles_post_ra>
// kernel: tpu_custom_call.1
= control target key start
LH: loop header
LB: loop body
LE: loop exit
PB: predicated region body
PF: predicated region fallthrough
CT: control target
= control target key end

     0   :  { %13 = vsyncpa [#allocation4], 0  ;;  %s571_s0 = inlined_call_operand.hbm [shape: f32[8,8], index: 0, kind: input, shape index: {}]   ;;  %s572_s1 = inlined_call_operand.hbm [shape: f32[8,256], index: 1, kind: input, shape index: {}]   ;;  %s573_s2 = inlined_call_operand.vmem [shape: f32[1,256], index: 2, kind: input, shape index: {}]   ;;  %s574_s3 = inlined_call_operand.hbm [shape: f32[256,256], index: 3, kind: input, shape index: {}]   ;;  %s575_s4 = inlined_call_operand.vmem [shape: f32[1,256], index: 4, kind: input, shape index: {}]   ;;  %s576_s5 = inlined_call_operand.vmem [shape: f32[1,256], index: 5, kind: input, shape index: {}]   ;;  %s577_s6 = inlined_call_operand.<no memory space> [shape: f32[1,1], index: 6, kind: input, shape index: {}]   ;;  %s578_s7 = inlined_call_operand.vmem [shape: f32[8,1], index: 7, kind: output, shape index: {}]  }
   0x1   :  { %14 = vsyncpa [#allocation6], 0  ;;  %s474_s24 = smov [#allocation5]   ;;  %s475_s26 = smov [#allocation3]  }
   0x2   :  { %s31_s25 = sshll.u32 %s474_s24, 4  ;;  %s21_s27 = sshll.u32 %s475_s26, 4  ;;  %s32_s25 = int_to_ptr.vmem [resolvable:$true] %s31_s25  ;;  %s22_s27 = int_to_ptr.vmem [resolvable:$true] %s21_s27 }
   0x3   :  { %s404_s30 = scalar_lea.hbm %s572_s1, 256 }
   0x4   :  { %p405_p0 = scmp.ne.s32.totalorder %s572_s1, %s404_s30  ;;  %p408_p1 = scmp.lt.u32.totalorder %s404_s30, %s572_s1 }
   0x6   :  { %p410_p2 = pnand %p408_p1, %p405_p0 }
   0x8   :  { %413 = shalt.err (!%p410_p2)
}
   0x9   :  { %s414_s12 = scalar_lea.vmem %s32_s25, 256  ;;  %p419_p4 = scmp.lt.s32.totalorder %s32_s25, %s32_s25 }
   0xa   :  { %p415_p3 = scmp.ne.s32.totalorder %s32_s25, %s414_s12  ;;  %p420_p5 = scmp.lt.s32.totalorder %s414_s12, %s414_s12 }
   0xc   :  { %p421_p6 = por %p420_p5, %p419_p4 }
   0xe   :  { %p422_p7 = pnand %p421_p6, %p415_p3 }
  0x10   :  { %425 = shalt.err (!%p422_p7)
}
  0x11   :  { %34 = dma.hbm_to_vmem [thread:$0]  %s572_s1, 256, %s32_s25, [#allocation6]  }
  0x12   :  { %s426_s17 = scalar_lea.hbm %s571_s0, 128 }
  0x13   :  { %p427_p8 = scmp.ne.s32.totalorder %s571_s0, %s426_s17  ;;  %p430_p9 = scmp.lt.u32.totalorder %s426_s17, %s571_s0 }
  0x15   :  { %p432_p10 = pnand %p430_p9, %p427_p8 }
  0x17   :  { %435 = shalt.err (!%p432_p10)
}
  0x18   :  { %s436_s22 = scalar_lea.vmem %s22_s27, 128  ;;  %p441_p12 = scmp.lt.s32.totalorder %s22_s27, %s22_s27 }
  0x19   :  { %p437_p11 = scmp.ne.s32.totalorder %s22_s27, %s436_s22  ;;  %p442_p13 = scmp.lt.s32.totalorder %s436_s22, %s436_s22 }
  0x1b   :  { %p443_p0 = por %p442_p13, %p441_p12 }
  0x1d   :  { %p444_p1 = pnand %p443_p0, %p437_p11 }
  0x1f   :  { %447 = shalt.err (!%p444_p1)
}
  0x20   :  { %24 = dma.hbm_to_vmem [thread:$0]  %s571_s0, 128, %s22_s27, [#allocation4]  }
  0x21   :  { %s476_s24 = smov [#allocation7]   ;;  %s448_s29 = scalar_lea.hbm %s574_s3, 8192 }
  0x22   :  { %s42_s25 = sshll.u32 %s476_s24, 4  ;;  %p449_p2 = scmp.ne.s32.totalorder %s574_s3, %s448_s29  ;;  %s43_s25 = int_to_ptr.vmem [resolvable:$true] %s42_s25 }
  0x23   :  { %p452_p3 = scmp.lt.u32.totalorder %s448_s29, %s574_s3 }
  0x25   :  { %p454_p4 = pnand %p452_p3, %p449_p2 }
  0x27   :  { %457 = shalt.err (!%p454_p4)
}
  0x28   :  { %s458_s11 = scalar_lea.vmem %s43_s25, 8192  ;;  %p463_p6 = scmp.lt.s32.totalorder %s43_s25, %s43_s25 }
  0x29   :  { %p459_p5 = scmp.ne.s32.totalorder %s43_s25, %s458_s11  ;;  %p464_p7 = scmp.lt.s32.totalorder %s458_s11, %s458_s11 }
  0x2b   :  { %p465_p8 = por %p464_p7, %p463_p6 }
  0x2d   :  { %p466_p9 = pnand %p465_p8, %p459_p5 }
  0x2f   :  { %469 = shalt.err (!%p466_p9)
}
  0x30   :  { %s477_s0 = smov 256   ;;  %s478_s27 = smov 16  }
  0x31   :  { %48 = dma.hbm_to_vmem [thread:$0]  %s574_s3, 8192, %s43_s25, [#allocation6], %s477_s0, %s477_s0, %s478_s27  }
  0x32   :  { %470 = dma.done.wait [#allocation4], 128  }
  0x33   :  { %471 = vsyncadd [#allocation4], 4294967168 }
  0x34   :  { %472 = dma.done.wait [#allocation6], 8448  }
  0x35   :  { %473 = vsyncadd [#allocation6], 4294958848  ;;  %v479_v0 = vmov 0.0   ;;  %v66_v1 = vld [vmem:[#allocation5 + $0x8] sm:$0xff]  ;;  %v65_v2 = vld [vmem:[#allocation5] sm:$0xff]  ;;  %vm79_vm0 = vcmask 64512  }
  0x36   :  { %147 = vmatprep.mubr.f32.mxu0 %v479_v0  ;;  %v64_v3 = vld [vmem:[#allocation3] sm:$0xff]  ;;  %83 = vmatprep.subr.mxu0 %v66_v1  ;;  %v159_v5 = vld [vmem:[#allocation7 + $0x18] sm:$0xff]  ;;  %v156_v6 = vld [vmem:[#allocation7] sm:$0xff]  ;;  %vm325_vm1 = vcmask 7168  }
  0x37   :  { %v157_v4 = vld [vmem:[#allocation7 + $0x8] sm:$0xff]  ;;  %84 = vmatpush1.msra.mxu0 %v65_v2  ;;  %v158_v8 = vld [vmem:[#allocation7 + $0x10] sm:$0xff]  ;;  %v163_v10 = vld [vmem:[#allocation7 + $0x38] sm:$0xff] }
  0x38   :  { %v334_v7 = vpack.c.bf16 %v159_v5, %v157_v4  ;;  %v161_v9 = vld [vmem:[#allocation7 + $0x28] sm:$0xff]  ;;  %333 = vmatmul.mubr.msk.f32.vlgmr.msra.gmra.mrb[0].mxu0 %vm79_vm0, %v64_v3  ;;  %v336_v11 = vpack.c.bf16 %v158_v8, %v156_v6  ;;  %v160_v13 = vld [vmem:[#allocation7 + $0x20] sm:$0xff]  ;;  %v162_v14 = vld [vmem:[#allocation7 + $0x30] sm:$0xff] }
  0x39   :  { %v338_v12 = vpack.c.bf16 %v163_v10, %v161_v9  ;;  %v165_v15 = vld [vmem:[#allocation7 + $0x48] sm:$0xff]  ;;  %v167_v16 = vld [vmem:[#allocation7 + $0x58] sm:$0xff]  ;;  %v340_v17 = vpack.c.bf16 %v162_v14, %v160_v13  ;;  %v164_v19 = vld [vmem:[#allocation7 + $0x40] sm:$0xff] }
  0x3a   :  { %335 = vmatprep.subr.bf16.mxu1 %v334_v7  ;;  %v342_v18 = vpack.c.bf16 %v167_v16, %v165_v15  ;;  %v166_v20 = vld [vmem:[#allocation7 + $0x50] sm:$0xff]  ;;  %v169_v21 = vld [vmem:[#allocation7 + $0x68] sm:$0xff]  ;;  %v171_v22 = vld [vmem:[#allocation7 + $0x78] sm:$0xff] }
  0x3b   :  { %337 = vmatpush1.bf16.msra.mxu1 %v336_v11  ;;  %v344_v23 = vpack.c.bf16 %v166_v20, %v164_v19  ;;  %v346_v24 = vpack.c.bf16 %v171_v22, %v169_v21  ;;  %v168_v25 = vld [vmem:[#allocation7 + $0x60] sm:$0xff]  ;;  %v170_v26 = vld [vmem:[#allocation7 + $0x70] sm:$0xff]  ;;  %v173_v27 = vld [vmem:[#allocation7 + $0x88] sm:$0xff] }
  0x3c   :  { %339 = vmatprep.subr.bf16.mxu1 %v338_v12  ;;  %v175_v28 = vld [vmem:[#allocation7 + $0x98] sm:$0xff]  ;;  %v348_v29 = vpack.c.bf16 %v170_v26, %v168_v25  ;;  %v172_v31 = vld [vmem:[#allocation7 + $0x80] sm:$0xff]  ;;  %v174_v32 = vld [vmem:[#allocation7 + $0x90] sm:$0xff] }
  0x3d   :  { %v350_v30 = vpack.c.bf16 %v175_v28, %v173_v27  ;;  %v177_v33 = vld [vmem:[#allocation7 + $0xa8] sm:$0xff]  ;;  %v179_v34 = vld [vmem:[#allocation7 + $0xb8] sm:$0xff]  ;;  %v352_v35 = vpack.c.bf16 %v174_v32, %v172_v31  ;;  %v176_v37 = vld [vmem:[#allocation7 + $0xa0] sm:$0xff] }
  0x3e   :  { %v354_v36 = vpack.c.bf16 %v179_v34, %v177_v33  ;;  %v178_v38 = vld [vmem:[#allocation7 + $0xb0] sm:$0xff]  ;;  %v181_v39 = vld [vmem:[#allocation7 + $0xc8] sm:$0xff]  ;;  %v183_v40 = vld [vmem:[#allocation7 + $0xd8] sm:$0xff] }
  0x3f   :  { %341 = vmatpush1.bf16.msra.mxu1 %v340_v17  ;;  %v356_v41 = vpack.c.bf16 %v178_v38, %v176_v37  ;;  %v358_v42 = vpack.c.bf16 %v183_v40, %v181_v39  ;;  %v180_v43 = vld [vmem:[#allocation7 + $0xc0] sm:$0xff]  ;;  %v182_v44 = vld [vmem:[#allocation7 + $0xd0] sm:$0xff]  ;;  %v185_v45 = vld [vmem:[#allocation7 + $0xe8] sm:$0xff] }
  0x40   :  { %343 = vmatprep.subr.bf16.mxu1 %v342_v18  ;;  %v187_v46 = vld [vmem:[#allocation7 + $0xf8] sm:$0xff]  ;;  %v360_v47 = vpack.c.bf16 %v182_v44, %v180_v43  ;;  %v184_v49 = vld [vmem:[#allocation7 + $0xe0] sm:$0xff]  ;;  %v186_v50 = vld [vmem:[#allocation7 + $0xf0] sm:$0xff] }
  0x41   :  { %v362_v48 = vpack.c.bf16 %v187_v46, %v185_v45  ;;  %v189_v51 = vld [vmem:[#allocation7 + $0x108] sm:$0xff]  ;;  %v191_v52 = vld [vmem:[#allocation7 + $0x118] sm:$0xff]  ;;  %v364_v53 = vpack.c.bf16 %v186_v50, %v184_v49  ;;  %v188_v55 = vld [vmem:[#allocation7 + $0x100] sm:$0xff] }
  0x42   :  { %v366_v54 = vpack.c.bf16 %v191_v52, %v189_v51  ;;  %v190_v56 = vld [vmem:[#allocation7 + $0x110] sm:$0xff]  ;;  %v193_v57 = vld [vmem:[#allocation7 + $0x128] sm:$0xff]  ;;  %v195_v58 = vld [vmem:[#allocation7 + $0x138] sm:$0xff] }
  0x43   :  { %345 = vmatpush1.bf16.msra.mxu1 %v344_v23  ;;  %v368_v59 = vpack.c.bf16 %v190_v56, %v188_v55  ;;  %v370_v60 = vpack.c.bf16 %v195_v58, %v193_v57  ;;  %v192_v61 = vld [vmem:[#allocation7 + $0x120] sm:$0xff]  ;;  %v194_v62 = vld [vmem:[#allocation7 + $0x130] sm:$0xff]  ;;  %v197_v63 = vld [vmem:[#allocation7 + $0x148] sm:$0xff] }
  0x44   :  { %347 = vmatprep.subr.bf16.mxu1 %v346_v24  ;;  %v199_v0 = vld [vmem:[#allocation7 + $0x158] sm:$0xff]  ;;  %v372_v1 = vpack.c.bf16 %v194_v62, %v192_v61  ;;  %v196_v3 = vld [vmem:[#allocation7 + $0x140] sm:$0xff]  ;;  %v198_v4 = vld [vmem:[#allocation7 + $0x150] sm:$0xff] }
  0x45   :  { %v374_v2 = vpack.c.bf16 %v199_v0, %v197_v63  ;;  %v201_v5 = vld [vmem:[#allocation7 + $0x168] sm:$0xff]  ;;  %v203_v6 = vld [vmem:[#allocation7 + $0x178] sm:$0xff]  ;;  %v376_v7 = vpack.c.bf16 %v198_v4, %v196_v3  ;;  %v200_v9 = vld [vmem:[#allocation7 + $0x160] sm:$0xff]  ;;  %v323_v0 = vstv %s577_s6 }
  0x46   :  { %v378_v8 = vpack.c.bf16 %v203_v6, %v201_v5  ;;  %v202_v10 = vld [vmem:[#allocation7 + $0x170] sm:$0xff]  ;;  %v205_v11 = vld [vmem:[#allocation7 + $0x188] sm:$0xff]  ;;  %v207_v12 = vld [vmem:[#allocation7 + $0x198] sm:$0xff] }
  0x47   :  { %349 = vmatpush1.bf16.msra.mxu1 %v348_v29  ;;  %v380_v13 = vpack.c.bf16 %v202_v10, %v200_v9  ;;  %v382_v14 = vpack.c.bf16 %v207_v12, %v205_v11  ;;  %v204_v15 = vld [vmem:[#allocation7 + $0x180] sm:$0xff]  ;;  %v206_v16 = vld [vmem:[#allocation7 + $0x190] sm:$0xff]  ;;  %v209_v17 = vld [vmem:[#allocation7 + $0x1a8] sm:$0xff] }
  0x48   :  { %351 = vmatprep.subr.bf16.mxu1 %v350_v30  ;;  %v211_v18 = vld [vmem:[#allocation7 + $0x1b8] sm:$0xff]  ;;  %v384_v19 = vpack.c.bf16 %v206_v16, %v204_v15  ;;  %v208_v21 = vld [vmem:[#allocation7 + $0x1a0] sm:$0xff]  ;;  %v210_v22 = vld [vmem:[#allocation7 + $0x1b0] sm:$0xff] }
  0x49   :  { %v386_v20 = vpack.c.bf16 %v211_v18, %v209_v17  ;;  %v213_v23 = vld [vmem:[#allocation7 + $0x1c8] sm:$0xff]  ;;  %v215_v24 = vld [vmem:[#allocation7 + $0x1d8] sm:$0xff]  ;;  %v388_v25 = vpack.c.bf16 %v210_v22, %v208_v21  ;;  %v212_v27 = vld [vmem:[#allocation7 + $0x1c0] sm:$0xff] }
  0x4a   :  { %v390_v26 = vpack.c.bf16 %v215_v24, %v213_v23  ;;  %v214_v28 = vld [vmem:[#allocation7 + $0x1d0] sm:$0xff]  ;;  %v217_v30 = vld [vmem:[#allocation7 + $0x1e8] sm:$0xff]  ;;  %v219_v31 = vld [vmem:[#allocation7 + $0x1f8] sm:$0xff] }
  0x4b   :  { %353 = vmatpush1.bf16.msra.mxu1 %v352_v35  ;;  %v392_v29 = vpack.c.bf16 %v214_v28, %v212_v27  ;;  %v394_v32 = vpack.c.bf16 %v219_v31, %v217_v30  ;;  %v216_v33 = vld [vmem:[#allocation7 + $0x1e0] sm:$0xff]  ;;  %v218_v34 = vld [vmem:[#allocation7 + $0x1f0] sm:$0xff]  ;;  %v67_v39 = vld [vmem:[%s573_s2] sm:$0x3] }
  0x4c   :  { %355 = vmatprep.subr.bf16.mxu1 %v354_v36  ;;  %v396_v35 = vpack.c.bf16 %v218_v34, %v216_v33  ;;  %v69_v36 = vlaneseq  ;;  %v220_v49 = vld [vmem:[%s575_s4] sm:$0x3] }
  0x4d   :  { %v305_v52 = vld [vmem:[%s576_s5] sm:$0x3] }
  0x4e   :  { %v70_v37 = vshrl.u32 %v69_v36, 7 }
  0x4f   :  { %357 = vmatpush1.bf16.msra.mxu1 %v356_v41 }
  0x50   :  { %359 = vmatprep.subr.bf16.mxu1 %v358_v42  ;;  %v71_v38 = vsub.s32 0, %v70_v37  ;;  %v75_v40 = vsub.s32 1, %v70_v37 }
  0x52   :  { %v72_v41 = vrot.slane %v67_v39, %v71_v38  ;;  %v76_v42 = vrot.slane %v67_v39, %v75_v40  ;;  %v225_v50 = vrot.slane %v220_v49, %v71_v38  ;;  %v229_v51 = vrot.slane %v220_v49, %v75_v40 }
  0x53   :  { %361 = vmatpush1.bf16.msra.mxu1 %v360_v47  ;;  %v310_v56 = vrot.slane %v305_v52, %v71_v38  ;;  %v314_v58 = vrot.slane %v305_v52, %v75_v40 }
  0x54   :  { %363 = vmatprep.subr.bf16.mxu1 %v362_v48 }
  0x57   :  { %365 = vmatpush1.bf16.msra.mxu1 %v364_v53 }
  0x58   :  { %367 = vmatprep.subr.bf16.mxu1 %v366_v54 }
  0x5b   :  { %369 = vmatpush1.bf16.msra.mxu1 %v368_v59 }
  0x5c   :  { %371 = vmatprep.subr.bf16.mxu1 %v370_v60 }
  0x5f   :  { %373 = vmatpush1.bf16.msra.mxu1 %v372_v1 }
  0x60   :  { %375 = vmatprep.subr.bf16.mxu1 %v374_v2 }
  0x63   :  { %377 = vmatpush1.bf16.msra.mxu1 %v376_v7 }
  0x64   :  { %379 = vmatprep.subr.bf16.mxu1 %v378_v8 }
  0x67   :  { %381 = vmatpush1.bf16.msra.mxu1 %v380_v13 }
  0x68   :  { %383 = vmatprep.subr.bf16.mxu1 %v382_v14 }
  0x6b   :  { %385 = vmatpush1.bf16.msra.mxu1 %v384_v19 }
  0x6c   :  { %387 = vmatprep.subr.bf16.mxu1 %v386_v20 }
  0x6f   :  { %389 = vmatpush1.bf16.msra.mxu1 %v388_v25 }
  0x70   :  { %391 = vmatprep.subr.bf16.mxu1 %v390_v26 }
  0x73   :  { %393 = vmatpush1.bf16.msra.mxu1 %v392_v29 }
  0x74   :  { %395 = vmatprep.subr.bf16.mxu1 %v394_v32 }
  0x77   :  { %397 = vmatpush1.bf16.msra.mxu1 %v396_v35 }
 0x10b   :  { %v149_v43 = vpop.f32.mrb[0].mxu0 }
 0x10c   :  { %v150_v44 = vadd.f32 %v149_v43, %v72_v41  ;;  %v151_v45 = vpop.f32.mrb[1].mxu0 }
 0x10d   :  { %v152_v46 = vadd.f32 %v151_v45, %v76_v42 }
 0x10e   :  { %v154_v48 = vmax.f32 %v150_v44, 0.0 }
 0x10f   :  { %v155_v47 = vmax.f32 %v152_v46, 0.0 }
 0x111   :  { %296 = vmatprep.mubr.f32.mxu1 %v155_v47 }
 0x112   :  { %297 = vmatmul.mubr.f32.vlgmr.msra.gmra.mrb[0].mxu1 %v154_v48 }
 0x1e5   :  { %v298_v53 = vpop.f32.mrb[0].mxu1 }
 0x1e6   :  { %v299_v54 = vadd.f32 %v298_v53, %v225_v50  ;;  %v300_v55 = vpop.f32.mrb[1].mxu1 }
 0x1e7   :  { %v301_v57 = vadd.f32 %v300_v55, %v229_v51 }
 0x1e8   :  { %v303_v59 = vmax.f32 %v299_v54, 0.0 }
 0x1e9   :  { %v304_v60 = vmax.f32 %v301_v57, 0.0 }
 0x1ea   :  { %v317_v61 = vmul.f32 %v310_v56, %v303_v59 }
 0x1eb   :  { %v318_v62 = vmul.f32 %v314_v58, %v304_v60 }
 0x1ed   :  { %v319_v63 = vadd.f32 %v318_v62, %v317_v61 }
 0x1ef   :  { %320 = vadd.xlane.f32.xlu0 %v319_v63 }
 0x27c   :  { %v321_v1 = vpop.xlane.xlu0 %320 }
 0x27d   :  { %v324_v2 = vadd.f32 %v323_v0, %v321_v1 }
 0x27f   :  { %326 = vst.msk [vmem:[%s578_s7] sm:$0xff] %vm325_vm1, %v324_v2 }
 0x280   :  { %331 = vsyncpa [#allocation4], 1 }
 0x281   :  { %332 = vsyncpa [#allocation6], 1 }

</bundles_post_ra>
